<compile_context>
chip_gen: v5e
topology: v5e:2x2
jax: 0.10.0
libtpu: 0.0.40
codegen_flags: <defaults>
</compile_context>

<pallas_src>
import math

import jax
import jax.numpy as jnp
import numpy as np
from jax.experimental import pallas as pl
from jax.experimental.pallas import tpu as pltpu

# ----------------------------- config -----------------------------
B = 2          # batch
S = 8          # sequence length
H = 32         # hidden size
NH = 2         # attention heads
HD = H // NH   # head dim
FF = 4 * H     # ffn inner size (=128, lane-dense)
V = 100        # vocab size
P_LABELS = 10  # product_num_labels
H_LABELS = 6   # hazard_num_labels
LPAD = 128     # lane width of the packed slab / fused classifier output
ALPHA = 1.0
GAMMA = 2.0    # hard-coded as an explicit square below

# --- packed parameter slab row offsets (one DMA for every weight/bias/LN param) ---
QKV_R = 0                  # (H, 3H)  fused wq|wk|wv   (cols 0:96)
WO_R = QKV_R + H           # (H, H)   wo               (cols 0:32)
W1_R = WO_R + H            # (H, FF)  ffn w1           (cols 0:128)
W2_R = W1_R + H            # (FF, H)  ffn w2           (cols 0:32)
WHEAD_R = W2_R + FF        # (H, 128) fused wp|wh      (cols 0:16)
VEC_R = WHEAD_R + H        # (16,128) packed biases / LayerNorm params
VEC_ROWS = 16
SLAB_ROWS = VEC_R + VEC_ROWS   # 272

XIN_ROWS = 24              # rows 0:16 = x (B*S,H); rows 16:18 = mask (B,S in cols 0:S); rest pad
OUT_ROWS = 8               # unmasked (8,128) output: rows 0:B logits, [7,0] = loss


# ------------- single fused kernel: encoder + CLS pool + heads + focal loss -------------
def fused_model_kernel(labels_ref,            # SMEM scalar prefetch: int32 (2B,)
                       xm_ref, slab_ref,      # (24, H) f32, (272, 128) f32
                       out_ref):              # (8, 128) f32
    f32 = jnp.float32
    x = xm_ref[0:B * S, :]                    # (B*S, H)
    mask = xm_ref[B * S:B * S + B, 0:S]       # (B, S), 1.0 = attend

    # static row-windows into the single packed parameter slab (aligned 128-lane loads)
    wqkv = slab_ref[QKV_R:QKV_R + H, :]       # (H,128), cols 0:3H valid, rest zero
    wo_p = slab_ref[WO_R:WO_R + H, :]         # (H,128), cols 0:H valid
    w1 = slab_ref[W1_R:W1_R + H, :]           # (H,FF)
    w2_p = slab_ref[W2_R:W2_R + FF, :]        # (FF,128), cols 0:H valid
    whead = slab_ref[WHEAD_R:WHEAD_R + H, :]  # (H,128), cols 0:16 valid
    vec = slab_ref[VEC_R:VEC_R + VEC_ROWS, :] # (16,128)

    bqkv = vec[0:1, 0:3 * H]
    bo = vec[1:2, 0:H]
    g1 = vec[2:3, 0:H]
    be1 = vec[3:4, 0:H]
    b1 = vec[4:5, :]
    b2 = vec[5:6, 0:H]
    g2 = vec[6:7, 0:H]
    be2 = vec[7:8, 0:H]
    bhead = vec[8:9, :]

    def layernorm(v, g, b):
        mu = jnp.mean(v, axis=-1, keepdims=True)
        var = jnp.mean((v - mu) ** 2, axis=-1, keepdims=True)
        return (v - mu) * jax.lax.rsqrt(var + 1e-12) * g + b

    # fused QKV projection: one (B*S, H) x (H, 128) matmul (cols 96:128 are zero padding)
    qkv = jnp.dot(x, wqkv, preferred_element_type=f32)[:, 0:3 * H] + bqkv
    q = qkv[:, 0:H]
    k = qkv[:, H:2 * H]
    v = qkv[:, 2 * H:3 * H]

    # Stack all (batch, head) pairs along a leading batch axis -> two batched contractions,
    # back-to-back MXU pushes, no explicit transposes.
    def split_heads(t):  # (B*S, H) -> (B*NH, S, HD)
        parts = [t[b * S:(b + 1) * S, h * HD:(h + 1) * HD].reshape(1, S, HD)
                 for b in range(B) for h in range(NH)]
        return jnp.concatenate(parts, axis=0)

    qh = split_heads(q)
    kh = split_heads(k)
    vh = split_heads(v)

    neg = (1.0 - mask) * 1e9                                   # (B, S) additive key-axis bias
    neg3 = jnp.concatenate(
        [neg[b:b + 1, :].reshape(1, 1, S) for b in range(B) for _ in range(NH)], axis=0)

    scale = 1.0 / math.sqrt(HD)
    s = jnp.einsum('bqd,bkd->bqk', qh, kh, preferred_element_type=f32) * scale - neg3
    s = s - jnp.max(s, axis=-1, keepdims=True)
    p = jnp.exp(s)
    p = p * pl.reciprocal(jnp.sum(p, axis=-1, keepdims=True), approx=True)
    ctx = jnp.einsum('bqk,bkd->bqd', p, vh, preferred_element_type=f32)   # (B*NH, S, HD)

    # lane-concat the two head contexts (one vreg at H=32), sublane-concat batches,
    # then ONE (B*S, H) x (H, H) output projection against the full wo.
    ctx_flat = jnp.concatenate(
        [jnp.concatenate([ctx[b * NH + h] for h in range(NH)], axis=-1) for b in range(B)],
        axis=0)                                                           # (B*S, H)
    attn_out = jnp.dot(ctx_flat, wo_p, preferred_element_type=f32)[:, 0:H] + bo

    h1 = layernorm(x + attn_out, g1, be1)
    inner = jax.nn.gelu(jnp.dot(h1, w1, preferred_element_type=f32) + b1, approximate=True)
    ffn_out = jnp.dot(inner, w2_p, preferred_element_type=f32)[:, 0:H] + b2
    h2 = layernorm(h1 + ffn_out, g2, be2)

    # CLS pooling (row 0 of each sequence); Dropout(0.1) is eval-mode identity.
    # TODO(synk): training-mode dropout would need pltpu.prng_seed/prng_random_bits masking.
    # Pad pooled to 8 rows so the final logits store is a full unmasked (8,128) vst.
    pooled = jnp.concatenate(
        [h2[b * S:b * S + 1, :] for b in range(B)]
        + [jnp.zeros((OUT_ROWS - B, H), f32)], axis=0)                    # (8, H)

    # Fused classifier heads -> lane-dense (8,128) logits (cols 0:10 product, 10:16 hazard).
    fused_logits = jnp.dot(pooled, whead, preferred_element_type=f32) + bhead   # (8, 128)

    # ---- vectorized focal loss: both heads x all rows in one masked LSE pass ----
    # TODO(synk): weighted-CrossEntropyLoss branch (class_weights is not None) not implemented;
    # default module config uses the FocalLoss path implemented here.
    L = fused_logits[0:B, :]                                              # (B, 128)
    colB = jax.lax.broadcasted_iota(jnp.int32, (B, LPAD), 1)
    rows = jnp.concatenate(
        [jnp.where(colB < P_LABELS, L, -1e30),
         jnp.where((colB >= P_LABELS) & (colB < P_LABELS + H_LABELS), L, -1e30)],
        axis=0)                                                           # (2B, 128)

    # per-row target column: product rows -> label, hazard rows -> P_LABELS + label
    row2 = jax.lax.broadcasted_iota(jnp.int32, (2 * B, 1), 0)
    tgt = jnp.zeros((2 * B, 1), jnp.int32)
    for i in range(B):
        tgt = jnp.where(row2 == i, labels_ref[i], tgt)
        tgt = jnp.where(row2 == B + i, P_LABELS + labels_ref[B + i], tgt)

    m = jnp.max(rows, axis=-1, keepdims=True)
    lse = m + jnp.log(jnp.sum(jnp.exp(rows - m), axis=-1, keepdims=True))
    col2 = jax.lax.broadcasted_iota(jnp.int32, (2 * B, LPAD), 1)
    picked = jnp.sum(jnp.where(col2 == tgt, rows, 0.0), axis=-1, keepdims=True)
    ce = lse - picked                                                     # (2B, 1)
    pt = jnp.exp(-ce)
    omp = 1.0 - pt
    focal = ALPHA * omp * omp * ce             # GAMMA == 2 -> explicit square (no pow/log path)
    loss = (0.5 / B) * jnp.sum(focal)          # = 0.5*mean(product) + 0.5*mean(hazard)

    # single unmasked (8,128) store: logits + scalar loss at [OUT_ROWS-1, 0]
    row8 = jax.lax.broadcasted_iota(jnp.int32, (OUT_ROWS, LPAD), 0)
    col8 = jax.lax.broadcasted_iota(jnp.int32, (OUT_ROWS, LPAD), 1)
    out_ref[...] = jnp.where((row8 == OUT_ROWS - 1) & (col8 == 0), loss, fused_logits)


def run_fused_model(xm, slab, labels_packed):
    def im(i, lab):                            # index maps see (grid idx, prefetch ref)
        return (0, 0)

    return pl.pallas_call(
        fused_model_kernel,
        out_shape=jax.ShapeDtypeStruct((OUT_ROWS, LPAD), jnp.float32),
        grid_spec=pltpu.PrefetchScalarGridSpec(
            num_scalar_prefetch=1,             # packed labels -> SMEM scalars
            grid=(1,),                         # whole problem in one block (no pipelining needed)
            in_specs=[
                pl.BlockSpec((XIN_ROWS, H), im),        # activations + packed mask rows (1 DMA)
                pl.BlockSpec((SLAB_ROWS, LPAD), im),    # ALL weights/biases/LN params   (1 DMA)
            ],
            out_specs=pl.BlockSpec((OUT_ROWS, LPAD), im),
        ),
        compiler_params=pltpu.CompilerParams(dimension_semantics=("arbitrary",)),
    )(labels_packed, xm, slab)


# ----------- full forward (embedding gather in JAX, everything else in one kernel) -----------
def multitask_forward(word_emb, pos_emb, slab, input_ids, attention_mask,
                      product_labels, hazard_labels):
    # TODO(synk): at real BERT dims, move this gather into the kernel (scalar-prefetched ids +
    # pl.Element row index_map on word_emb) to avoid the HBM round trip of the (B,S,H) activations.
    x = jnp.take(word_emb, input_ids, axis=0) + pos_emb[None, :, :]          # (B, S, H)
    x_flat = x.reshape(B * S, H).astype(jnp.float32)

    extra = jnp.zeros((XIN_ROWS - B * S, H), jnp.float32)
    extra = extra.at[0:B, 0:S].set(attention_mask.astype(jnp.float32))
    xm = jnp.concatenate([x_flat, extra], axis=0)                            # (24, H)

    labels = jnp.concatenate([product_labels, hazard_labels]).astype(jnp.int32)   # (2B,)

    out = run_fused_model(xm, slab, labels)
    return {
        "loss": out[OUT_ROWS - 1, 0],
        "product_logits": out[0:B, 0:P_LABELS],
        "hazard_logits": out[0:B, P_LABELS:P_LABELS + H_LABELS],
    }


# ------------------- pure-JAX reference for sanity check -------------------
def reference_forward(params, input_ids, attention_mask, product_labels, hazard_labels):
    (word_emb, pos_emb, enc, wp, bp, wh, bh) = params
    (wq, bq, wk, bk, wv, bv, wo, bo, g1, b1ln, w1, b1, w2, b2, g2, b2ln) = enc
    x = jnp.take(word_emb, input_ids, axis=0) + pos_emb[None, :, :]
    mask = attention_mask.astype(jnp.float32)

    def ln(v, g, b):
        mu = jnp.mean(v, -1, keepdims=True)
        var = jnp.mean((v - mu) ** 2, -1, keepdims=True)
        return (v - mu) * jax.lax.rsqrt(var + 1e-12) * g + b

    q = x @ wq + bq; k = x @ wk + bk; v = x @ wv + bv
    qh = q.reshape(B, S, NH, HD).transpose(0, 2, 1, 3)
    kh = k.reshape(B, S, NH, HD).transpose(0, 2, 1, 3)
    vh = v.reshape(B, S, NH, HD).transpose(0, 2, 1, 3)
    s = jnp.einsum("bhqd,bhkd->bhqk", qh, kh) / math.sqrt(HD)
    s = s - (1.0 - mask)[:, None, None, :] * 1e9
    p = jax.nn.softmax(s, axis=-1)
    ctx = jnp.einsum("bhqk,bhkd->bhqd", p, vh).transpose(0, 2, 1, 3).reshape(B, S, H)
    h1 = ln(x + ctx @ wo + bo, g1, b1ln)
    ffn = jax.nn.gelu(h1 @ w1 + b1, approximate=True) @ w2 + b2
    h2 = ln(h1 + ffn, g2, b2ln)
    pooled = h2[:, 0]
    pls = pooled @ wp + bp
    hls = pooled @ wh + bh

    def focal(logits, labels):
        logp = jax.nn.log_softmax(logits, -1)
        ce = -jnp.take_along_axis(logp, labels[:, None], axis=-1)[:, 0]
        pt = jnp.exp(-ce)
        return jnp.mean(ALPHA * (1 - pt) ** GAMMA * ce)

    loss = 0.5 * focal(pls, product_labels) + 0.5 * focal(hls, hazard_labels)
    return {"loss": loss, "product_logits": pls, "hazard_logits": hls}


# ------------------------------- main -------------------------------
if __name__ == "__main__":
    root = jax.random.PRNGKey(0)
    keys = jax.random.split(root, 24)

    def nrm(k, shape, scale=0.02):
        return (scale * jax.random.normal(k, shape)).astype(jnp.float32)

    word_emb = nrm(keys[0], (V, H))
    pos_emb = nrm(keys[1], (S, H))
    wq, bq = nrm(keys[2], (H, H)), nrm(keys[3], (1, H))
    wk, bk = nrm(keys[4], (H, H)), nrm(keys[5], (1, H))
    wv, bv = nrm(keys[6], (H, H)), nrm(keys[7], (1, H))
    wo, bo = nrm(keys[8], (H, H)), nrm(keys[9], (1, H))
    g1, be1 = jnp.ones((1, H), jnp.float32), jnp.zeros((1, H), jnp.float32)
    w1, b1 = nrm(keys[10], (H, FF)), nrm(keys[11], (1, FF))
    w2, b2 = nrm(keys[12], (FF, H)), nrm(keys[13], (1, H))
    g2, be2 = jnp.ones((1, H), jnp.float32), jnp.zeros((1, H), jnp.float32)
    wp, bp = nrm(keys[14], (H, P_LABELS)), nrm(keys[15], (1, P_LABELS))
    wh, bh = nrm(keys[16], (H, H_LABELS)), nrm(keys[17], (1, H_LABELS))

    raw_enc = (wq, bq, wk, bk, wv, bv, wo, bo, g1, be1, w1, b1, w2, b2, g2, be2)
    raw_params = (word_emb, pos_emb, raw_enc, wp, bp, wh, bh)

    # --- ONE packed, lane-padded parameter slab consumed by the Pallas kernel (single DMA) ---
    slab = jnp.zeros((SLAB_ROWS, LPAD), jnp.float32)
    slab = slab.at[QKV_R:QKV_R + H, 0:3 * H].set(jnp.concatenate([wq, wk, wv], axis=1))
    slab = slab.at[WO_R:WO_R + H, 0:H].set(wo)
    slab = slab.at[W1_R:W1_R + H, 0:FF].set(w1)
    slab = slab.at[W2_R:W2_R + FF, 0:H].set(w2)
    slab = slab.at[WHEAD_R:WHEAD_R + H, 0:P_LABELS].set(wp)
    slab = slab.at[WHEAD_R:WHEAD_R + H, P_LABELS:P_LABELS + H_LABELS].set(wh)
    slab = slab.at[VEC_R + 0, 0:3 * H].set(jnp.concatenate([bq, bk, bv], axis=1)[0])
    slab = slab.at[VEC_R + 1, 0:H].set(bo[0])
    slab = slab.at[VEC_R + 2, 0:H].set(g1[0])
    slab = slab.at[VEC_R + 3, 0:H].set(be1[0])
    slab = slab.at[VEC_R + 4, 0:FF].set(b1[0])
    slab = slab.at[VEC_R + 5, 0:H].set(b2[0])
    slab = slab.at[VEC_R + 6, 0:H].set(g2[0])
    slab = slab.at[VEC_R + 7, 0:H].set(be2[0])
    slab = slab.at[VEC_R + 8, 0:P_LABELS].set(bp[0])
    slab = slab.at[VEC_R + 8, P_LABELS:P_LABELS + H_LABELS].set(bh[0])

    input_ids = jax.random.randint(keys[18], (B, S), 0, V, dtype=jnp.int32)
    attention_mask = jnp.concatenate(
        [jnp.ones((B, S - 2), jnp.int32), jnp.zeros((B, 2), jnp.int32)], axis=1)
    product_labels = jax.random.randint(keys[19], (B,), 0, P_LABELS, dtype=jnp.int32)
    hazard_labels = jax.random.randint(keys[20], (B,), 0, H_LABELS, dtype=jnp.int32)

    out = multitask_forward(word_emb, pos_emb, slab, input_ids, attention_mask,
                            product_labels, hazard_labels)
    out = jax.tree_util.tree_map(jax.block_until_ready, out)

    ref = reference_forward(raw_params, input_ids, attention_mask,
                            product_labels, hazard_labels)

    # Tolerance 1e-3: covers the approx-EUP reciprocal in the attention softmax and differing
    # f32 summation orders; far below any real numerical bug at these magnitudes.
    np.testing.assert_allclose(np.asarray(out["product_logits"]),
                               np.asarray(ref["product_logits"]), rtol=1e-3, atol=1e-3)
    np.testing.assert_allclose(np.asarray(out["hazard_logits"]),
                               np.asarray(ref["hazard_logits"]), rtol=1e-3, atol=1e-3)
    np.testing.assert_allclose(np.asarray(out["loss"]),
                               np.asarray(ref["loss"]), rtol=1e-3, atol=1e-3)
    print("KERNEL_OK")
</pallas_src>

<mosaic_0001>
module attributes {stable_mosaic.version = 11 : i64} {
  func.func @fused_model_kernel(%arg0: i32, %arg1: memref<4xi32, #tpu.memory_space<smem>>, %arg2: memref<24x32xf32, #tpu.memory_space<vmem>>, %arg3: memref<272x128xf32, #tpu.memory_space<vmem>>, %arg4: memref<8x128xf32, #tpu.memory_space<vmem>>) attributes {dimension_semantics = [#tpu.dimension_semantics<arbitrary>], iteration_bounds = array<i64: 1>, scalar_prefetch = 1 : i64, scratch_operands = 0 : i64, tpu.core_type = #tpu.core_type<tc>, window_params = [{pipeline_mode = #tpu.pipeline_mode<synchronous>, transform_indices = @transform_0, window_bounds = array<i64: 24, 32>}, {pipeline_mode = #tpu.pipeline_mode<synchronous>, transform_indices = @transform_1, window_bounds = array<i64: 272, 128>}, {pipeline_mode = #tpu.pipeline_mode<synchronous>, transform_indices = @transform_2, window_bounds = array<i64: 8, 128>}]} {
    %c0 = arith.constant 0 : index
    %c0_0 = arith.constant 0 : index
    %0 = vector.load %arg2[%c0, %c0_0] : memref<24x32xf32, #tpu.memory_space<vmem>>, vector<16x32xf32>
    %c16 = arith.constant 16 : index
    %c0_1 = arith.constant 0 : index
    %1 = vector.load %arg2[%c16, %c0_1] : memref<24x32xf32, #tpu.memory_space<vmem>>, vector<2x8xf32>
    %c0_2 = arith.constant 0 : index
    %c0_3 = arith.constant 0 : index
    %2 = vector.load %arg3[%c0_2, %c0_3] : memref<272x128xf32, #tpu.memory_space<vmem>>, vector<32x128xf32>
    %c32 = arith.constant 32 : index
    %c0_4 = arith.constant 0 : index
    %3 = vector.load %arg3[%c32, %c0_4] : memref<272x128xf32, #tpu.memory_space<vmem>>, vector<32x128xf32>
    %c64 = arith.constant 64 : index
    %c0_5 = arith.constant 0 : index
    %4 = vector.load %arg3[%c64, %c0_5] : memref<272x128xf32, #tpu.memory_space<vmem>>, vector<32x128xf32>
    %c96 = arith.constant 96 : index
    %c0_6 = arith.constant 0 : index
    %5 = vector.load %arg3[%c96, %c0_6] : memref<272x128xf32, #tpu.memory_space<vmem>>, vector<128x128xf32>
    %c224 = arith.constant 224 : index
    %c0_7 = arith.constant 0 : index
    %6 = vector.load %arg3[%c224, %c0_7] : memref<272x128xf32, #tpu.memory_space<vmem>>, vector<32x128xf32>
    %c256 = arith.constant 256 : index
    %c0_8 = arith.constant 0 : index
    %7 = vector.load %arg3[%c256, %c0_8] : memref<272x128xf32, #tpu.memory_space<vmem>>, vector<16x128xf32>
    %8 = vector.extract_strided_slice %7 {offsets = [0, 0], sizes = [1, 96], strides = [1, 1]} : vector<16x128xf32> to vector<1x96xf32>
    %9 = vector.extract_strided_slice %7 {offsets = [1, 0], sizes = [1, 32], strides = [1, 1]} : vector<16x128xf32> to vector<1x32xf32>
    %10 = vector.extract_strided_slice %7 {offsets = [2, 0], sizes = [1, 32], strides = [1, 1]} : vector<16x128xf32> to vector<1x32xf32>
    %11 = vector.extract_strided_slice %7 {offsets = [3, 0], sizes = [1, 32], strides = [1, 1]} : vector<16x128xf32> to vector<1x32xf32>
    %12 = vector.extract_strided_slice %7 {offsets = [4, 0], sizes = [1, 128], strides = [1, 1]} : vector<16x128xf32> to vector<1x128xf32>
    %13 = vector.extract_strided_slice %7 {offsets = [5, 0], sizes = [1, 32], strides = [1, 1]} : vector<16x128xf32> to vector<1x32xf32>
    %14 = vector.extract_strided_slice %7 {offsets = [6, 0], sizes = [1, 32], strides = [1, 1]} : vector<16x128xf32> to vector<1x32xf32>
    %15 = vector.extract_strided_slice %7 {offsets = [7, 0], sizes = [1, 32], strides = [1, 1]} : vector<16x128xf32> to vector<1x32xf32>
    %16 = vector.extract_strided_slice %7 {offsets = [8, 0], sizes = [1, 128], strides = [1, 1]} : vector<16x128xf32> to vector<1x128xf32>
    %cst = arith.constant dense<0.000000e+00> : vector<16x128xf32>
    %17 = tpu.matmul %0, %2, %cst {dimension_numbers = #tpu.dot_dimension_numbers<[1], [0], [0], [1], [0, 0, 1, 1], [], []>} : vector<16x32xf32>, vector<32x128xf32>, vector<16x128xf32> -> vector<16x128xf32>
    %18 = vector.extract_strided_slice %17 {offsets = [0, 0], sizes = [16, 96], strides = [1, 1]} : vector<16x128xf32> to vector<16x96xf32>
    %19 = vector.broadcast %8 : vector<1x96xf32> to vector<16x96xf32>
    %20 = arith.addf %18, %19 : vector<16x96xf32>
    %21 = vector.extract_strided_slice %20 {offsets = [0, 0], sizes = [16, 32], strides = [1, 1]} : vector<16x96xf32> to vector<16x32xf32>
    %22 = vector.extract_strided_slice %20 {offsets = [0, 32], sizes = [16, 32], strides = [1, 1]} : vector<16x96xf32> to vector<16x32xf32>
    %23 = vector.extract_strided_slice %20 {offsets = [0, 64], sizes = [16, 32], strides = [1, 1]} : vector<16x96xf32> to vector<16x32xf32>
    %24 = vector.extract_strided_slice %21 {offsets = [0, 0], sizes = [8, 16], strides = [1, 1]} : vector<16x32xf32> to vector<8x16xf32>
    %25 = vector.shape_cast %24 : vector<8x16xf32> to vector<1x8x16xf32>
    %26 = vector.extract_strided_slice %21 {offsets = [0, 16], sizes = [8, 16], strides = [1, 1]} : vector<16x32xf32> to vector<8x16xf32>
    %27 = vector.shape_cast %26 : vector<8x16xf32> to vector<1x8x16xf32>
    %28 = vector.extract_strided_slice %21 {offsets = [8, 0], sizes = [8, 16], strides = [1, 1]} : vector<16x32xf32> to vector<8x16xf32>
    %29 = vector.shape_cast %28 : vector<8x16xf32> to vector<1x8x16xf32>
    %30 = vector.extract_strided_slice %21 {offsets = [8, 16], sizes = [8, 16], strides = [1, 1]} : vector<16x32xf32> to vector<8x16xf32>
    %31 = vector.shape_cast %30 : vector<8x16xf32> to vector<1x8x16xf32>
    %32 = tpu.concatenate %25, %27, %29, %31 in 0 : vector<1x8x16xf32>, vector<1x8x16xf32>, vector<1x8x16xf32>, vector<1x8x16xf32> -> vector<4x8x16xf32>
    %33 = vector.extract_strided_slice %22 {offsets = [0, 0], sizes = [8, 16], strides = [1, 1]} : vector<16x32xf32> to vector<8x16xf32>
    %34 = vector.shape_cast %33 : vector<8x16xf32> to vector<1x8x16xf32>
    %35 = vector.extract_strided_slice %22 {offsets = [0, 16], sizes = [8, 16], strides = [1, 1]} : vector<16x32xf32> to vector<8x16xf32>
    %36 = vector.shape_cast %35 : vector<8x16xf32> to vector<1x8x16xf32>
    %37 = vector.extract_strided_slice %22 {offsets = [8, 0], sizes = [8, 16], strides = [1, 1]} : vector<16x32xf32> to vector<8x16xf32>
    %38 = vector.shape_cast %37 : vector<8x16xf32> to vector<1x8x16xf32>
    %39 = vector.extract_strided_slice %22 {offsets = [8, 16], sizes = [8, 16], strides = [1, 1]} : vector<16x32xf32> to vector<8x16xf32>
    %40 = vector.shape_cast %39 : vector<8x16xf32> to vector<1x8x16xf32>
    %41 = tpu.concatenate %34, %36, %38, %40 in 0 : vector<1x8x16xf32>, vector<1x8x16xf32>, vector<1x8x16xf32>, vector<1x8x16xf32> -> vector<4x8x16xf32>
    %42 = vector.extract_strided_slice %23 {offsets = [0, 0], sizes = [8, 16], strides = [1, 1]} : vector<16x32xf32> to vector<8x16xf32>
    %43 = vector.shape_cast %42 : vector<8x16xf32> to vector<1x8x16xf32>
    %44 = vector.extract_strided_slice %23 {offsets = [0, 16], sizes = [8, 16], strides = [1, 1]} : vector<16x32xf32> to vector<8x16xf32>
    %45 = vector.shape_cast %44 : vector<8x16xf32> to vector<1x8x16xf32>
    %46 = vector.extract_strided_slice %23 {offsets = [8, 0], sizes = [8, 16], strides = [1, 1]} : vector<16x32xf32> to vector<8x16xf32>
    %47 = vector.shape_cast %46 : vector<8x16xf32> to vector<1x8x16xf32>
    %48 = vector.extract_strided_slice %23 {offsets = [8, 16], sizes = [8, 16], strides = [1, 1]} : vector<16x32xf32> to vector<8x16xf32>
    %49 = vector.shape_cast %48 : vector<8x16xf32> to vector<1x8x16xf32>
    %50 = tpu.concatenate %43, %45, %47, %49 in 0 : vector<1x8x16xf32>, vector<1x8x16xf32>, vector<1x8x16xf32>, vector<1x8x16xf32> -> vector<4x8x16xf32>
    %cst_9 = arith.constant 1.000000e+00 : f32
    %51 = vector.broadcast %cst_9 : f32 to vector<2x8xf32>
    %52 = arith.subf %51, %1 : vector<2x8xf32>
    %cst_10 = arith.constant 1.000000e+09 : f32
    %53 = vector.broadcast %cst_10 : f32 to vector<2x8xf32>
    %54 = arith.mulf %52, %53 : vector<2x8xf32>
    %55 = vector.extract_strided_slice %54 {offsets = [0, 0], sizes = [1, 8], strides = [1, 1]} : vector<2x8xf32> to vector<1x8xf32>
    %56 = vector.shape_cast %55 : vector<1x8xf32> to vector<1x1x8xf32>
    %57 = vector.extract_strided_slice %54 {offsets = [0, 0], sizes = [1, 8], strides = [1, 1]} : vector<2x8xf32> to vector<1x8xf32>
    %58 = vector.shape_cast %57 : vector<1x8xf32> to vector<1x1x8xf32>
    %59 = vector.extract_strided_slice %54 {offsets = [1, 0], sizes = [1, 8], strides = [1, 1]} : vector<2x8xf32> to vector<1x8xf32>
    %60 = vector.shape_cast %59 : vector<1x8xf32> to vector<1x1x8xf32>
    %61 = vector.extract_strided_slice %54 {offsets = [1, 0], sizes = [1, 8], strides = [1, 1]} : vector<2x8xf32> to vector<1x8xf32>
    %62 = vector.shape_cast %61 : vector<1x8xf32> to vector<1x1x8xf32>
    %63 = tpu.concatenate %56, %58, %60, %62 in 0 : vector<1x1x8xf32>, vector<1x1x8xf32>, vector<1x1x8xf32>, vector<1x1x8xf32> -> vector<4x1x8xf32>
    "tpu.trace_start"() <{level = 10 : i32, message = "bqd,bkd->bqk"}> : () -> ()
    %cst_11 = arith.constant dense<0.000000e+00> : vector<4x8x8xf32>
    %64 = tpu.matmul %32, %41, %cst_11 {dimension_numbers = #tpu.dot_dimension_numbers<[2], [2], [1], [1], [0, 0, 0, 1, 1, 1], [0], [0]>} : vector<4x8x16xf32>, vector<4x8x16xf32>, vector<4x8x8xf32> -> vector<4x8x8xf32>
    "tpu.trace_stop"() : () -> ()
    %cst_12 = arith.constant 2.500000e-01 : f32
    %65 = vector.broadcast %cst_12 : f32 to vector<4x8x8xf32>
    %66 = arith.mulf %64, %65 : vector<4x8x8xf32>
    %67 = vector.broadcast %63 : vector<4x1x8xf32> to vector<4x8x8xf32>
    %68 = arith.subf %66, %67 : vector<4x8x8xf32>
    %cst_13 = arith.constant dense<0xFF800000> : vector<4x8xf32>
    %69 = vector.multi_reduction <maximumf>, %68, %cst_13 [2] : vector<4x8x8xf32> to vector<4x8xf32>
    %70 = vector.shape_cast %69 : vector<4x8xf32> to vector<4x8x1xf32>
    %71 = vector.broadcast %70 : vector<4x8x1xf32> to vector<4x8x8xf32>
    %72 = arith.subf %68, %71 : vector<4x8x8xf32>
    %73 = math.exp %72 : vector<4x8x8xf32>
    %cst_14 = arith.constant dense<0.000000e+00> : vector<4x8xf32>
    %74 = vector.multi_reduction <add>, %73, %cst_14 [2] : vector<4x8x8xf32> to vector<4x8xf32>
    %75 = vector.shape_cast %74 : vector<4x8xf32> to vector<4x8x1xf32>
    %76 = tpu.reciprocal %75 {approx = true} : vector<4x8x1xf32> -> vector<4x8x1xf32>
    %77 = vector.broadcast %76 : vector<4x8x1xf32> to vector<4x8x8xf32>
    %78 = arith.mulf %73, %77 : vector<4x8x8xf32>
    "tpu.trace_start"() <{level = 10 : i32, message = "bqk,bkd->bqd"}> : () -> ()
    %cst_15 = arith.constant dense<0.000000e+00> : vector<4x8x16xf32>
    %79 = tpu.matmul %78, %50, %cst_15 {dimension_numbers = #tpu.dot_dimension_numbers<[2], [1], [1], [2], [0, 0, 0, 1, 1, 2], [0], [0]>} : vector<4x8x8xf32>, vector<4x8x16xf32>, vector<4x8x16xf32> -> vector<4x8x16xf32>
    "tpu.trace_stop"() : () -> ()
    %80 = vector.extract_strided_slice %79 {offsets = [0, 0, 0], sizes = [1, 8, 16], strides = [1, 1, 1]} : vector<4x8x16xf32> to vector<1x8x16xf32>
    %81 = vector.shape_cast %80 : vector<1x8x16xf32> to vector<8x16xf32>
    %82 = vector.extract_strided_slice %79 {offsets = [1, 0, 0], sizes = [1, 8, 16], strides = [1, 1, 1]} : vector<4x8x16xf32> to vector<1x8x16xf32>
    %83 = vector.shape_cast %82 : vector<1x8x16xf32> to vector<8x16xf32>
    %84 = tpu.concatenate %81, %83 in 1 : vector<8x16xf32>, vector<8x16xf32> -> vector<8x32xf32>
    %85 = vector.extract_strided_slice %79 {offsets = [2, 0, 0], sizes = [1, 8, 16], strides = [1, 1, 1]} : vector<4x8x16xf32> to vector<1x8x16xf32>
    %86 = vector.shape_cast %85 : vector<1x8x16xf32> to vector<8x16xf32>
    %87 = vector.extract_strided_slice %79 {offsets = [3, 0, 0], sizes = [1, 8, 16], strides = [1, 1, 1]} : vector<4x8x16xf32> to vector<1x8x16xf32>
    %88 = vector.shape_cast %87 : vector<1x8x16xf32> to vector<8x16xf32>
    %89 = tpu.concatenate %86, %88 in 1 : vector<8x16xf32>, vector<8x16xf32> -> vector<8x32xf32>
    %90 = tpu.concatenate %84, %89 in 0 : vector<8x32xf32>, vector<8x32xf32> -> vector<16x32xf32>
    %cst_16 = arith.constant dense<0.000000e+00> : vector<16x128xf32>
    %91 = tpu.matmul %90, %3, %cst_16 {dimension_numbers = #tpu.dot_dimension_numbers<[1], [0], [0], [1], [0, 0, 1, 1], [], []>} : vector<16x32xf32>, vector<32x128xf32>, vector<16x128xf32> -> vector<16x128xf32>
    %92 = vector.extract_strided_slice %91 {offsets = [0, 0], sizes = [16, 32], strides = [1, 1]} : vector<16x128xf32> to vector<16x32xf32>
    %93 = vector.broadcast %9 : vector<1x32xf32> to vector<16x32xf32>
    %94 = arith.addf %92, %93 : vector<16x32xf32>
    %95 = arith.addf %0, %94 : vector<16x32xf32>
    %cst_17 = arith.constant dense<0.000000e+00> : vector<16xf32>
    %96 = vector.multi_reduction <add>, %95, %cst_17 [1] : vector<16x32xf32> to vector<16xf32>
    %97 = vector.shape_cast %96 : vector<16xf32> to vector<16x1xf32>
    %cst_18 = arith.constant 3.200000e+01 : f32
    %98 = vector.broadcast %cst_18 : f32 to vector<16x1xf32>
    %99 = arith.divf %97, %98 : vector<16x1xf32>
    %100 = vector.broadcast %99 : vector<16x1xf32> to vector<16x32xf32>
    %101 = arith.subf %95, %100 : vector<16x32xf32>
    %102 = arith.mulf %101, %101 : vector<16x32xf32>
    %cst_19 = arith.constant dense<0.000000e+00> : vector<16xf32>
    %103 = vector.multi_reduction <add>, %102, %cst_19 [1] : vector<16x32xf32> to vector<16xf32>
    %104 = vector.shape_cast %103 : vector<16xf32> to vector<16x1xf32>
    %cst_20 = arith.constant 3.200000e+01 : f32
    %105 = vector.broadcast %cst_20 : f32 to vector<16x1xf32>
    %106 = arith.divf %104, %105 : vector<16x1xf32>
    %107 = vector.broadcast %99 : vector<16x1xf32> to vector<16x32xf32>
    %108 = arith.subf %95, %107 : vector<16x32xf32>
    %cst_21 = arith.constant 9.99999996E-13 : f32
    %109 = vector.broadcast %cst_21 : f32 to vector<16x1xf32>
    %110 = arith.addf %106, %109 : vector<16x1xf32>
    %111 = math.rsqrt %110 : vector<16x1xf32>
    %112 = vector.broadcast %111 : vector<16x1xf32> to vector<16x32xf32>
    %113 = arith.mulf %108, %112 : vector<16x32xf32>
    %114 = vector.broadcast %10 : vector<1x32xf32> to vector<16x32xf32>
    %115 = arith.mulf %113, %114 : vector<16x32xf32>
    %116 = vector.broadcast %11 : vector<1x32xf32> to vector<16x32xf32>
    %117 = arith.addf %115, %116 : vector<16x32xf32>
    %cst_22 = arith.constant dense<0.000000e+00> : vector<16x128xf32>
    %118 = tpu.matmul %117, %4, %cst_22 {dimension_numbers = #tpu.dot_dimension_numbers<[1], [0], [0], [1], [0, 0, 1, 1], [], []>} : vector<16x32xf32>, vector<32x128xf32>, vector<16x128xf32> -> vector<16x128xf32>
    %119 = vector.broadcast %12 : vector<1x128xf32> to vector<16x128xf32>
    %120 = arith.addf %118, %119 : vector<16x128xf32>
    %121 = arith.mulf %120, %120 : vector<16x128xf32>
    %122 = arith.mulf %120, %121 : vector<16x128xf32>
    %cst_23 = arith.constant 4.471500e-02 : f32
    %123 = vector.broadcast %cst_23 : f32 to vector<16x128xf32>
    %124 = arith.mulf %123, %122 : vector<16x128xf32>
    %125 = arith.addf %120, %124 : vector<16x128xf32>
    %cst_24 = arith.constant 0.797884583 : f32
    %126 = vector.broadcast %cst_24 : f32 to vector<16x128xf32>
    %127 = arith.mulf %126, %125 : vector<16x128xf32>
    %128 = math.tanh %127 : vector<16x128xf32>
    %cst_25 = arith.constant 1.000000e+00 : f32
    %129 = vector.broadcast %cst_25 : f32 to vector<16x128xf32>
    %130 = arith.addf %129, %128 : vector<16x128xf32>
    %cst_26 = arith.constant 5.000000e-01 : f32
    %131 = vector.broadcast %cst_26 : f32 to vector<16x128xf32>
    %132 = arith.mulf %131, %130 : vector<16x128xf32>
    %133 = arith.mulf %120, %132 : vector<16x128xf32>
    %cst_27 = arith.constant dense<0.000000e+00> : vector<16x128xf32>
    %134 = tpu.matmul %133, %5, %cst_27 {dimension_numbers = #tpu.dot_dimension_numbers<[1], [0], [0], [1], [0, 0, 1, 1], [], []>} : vector<16x128xf32>, vector<128x128xf32>, vector<16x128xf32> -> vector<16x128xf32>
    %135 = vector.extract_strided_slice %134 {offsets = [0, 0], sizes = [16, 32], strides = [1, 1]} : vector<16x128xf32> to vector<16x32xf32>
    %136 = vector.broadcast %13 : vector<1x32xf32> to vector<16x32xf32>
    %137 = arith.addf %135, %136 : vector<16x32xf32>
    %138 = arith.addf %117, %137 : vector<16x32xf32>
    %cst_28 = arith.constant dense<0.000000e+00> : vector<16xf32>
    %139 = vector.multi_reduction <add>, %138, %cst_28 [1] : vector<16x32xf32> to vector<16xf32>
    %140 = vector.shape_cast %139 : vector<16xf32> to vector<16x1xf32>
    %cst_29 = arith.constant 3.200000e+01 : f32
    %141 = vector.broadcast %cst_29 : f32 to vector<16x1xf32>
    %142 = arith.divf %140, %141 : vector<16x1xf32>
    %143 = vector.broadcast %142 : vector<16x1xf32> to vector<16x32xf32>
    %144 = arith.subf %138, %143 : vector<16x32xf32>
    %145 = arith.mulf %144, %144 : vector<16x32xf32>
    %cst_30 = arith.constant dense<0.000000e+00> : vector<16xf32>
    %146 = vector.multi_reduction <add>, %145, %cst_30 [1] : vector<16x32xf32> to vector<16xf32>
    %147 = vector.shape_cast %146 : vector<16xf32> to vector<16x1xf32>
    %cst_31 = arith.constant 3.200000e+01 : f32
    %148 = vector.broadcast %cst_31 : f32 to vector<16x1xf32>
    %149 = arith.divf %147, %148 : vector<16x1xf32>
    %150 = vector.broadcast %142 : vector<16x1xf32> to vector<16x32xf32>
    %151 = arith.subf %138, %150 : vector<16x32xf32>
    %cst_32 = arith.constant 9.99999996E-13 : f32
    %152 = vector.broadcast %cst_32 : f32 to vector<16x1xf32>
    %153 = arith.addf %149, %152 : vector<16x1xf32>
    %154 = math.rsqrt %153 : vector<16x1xf32>
    %155 = vector.broadcast %154 : vector<16x1xf32> to vector<16x32xf32>
    %156 = arith.mulf %151, %155 : vector<16x32xf32>
    %157 = vector.broadcast %14 : vector<1x32xf32> to vector<16x32xf32>
    %158 = arith.mulf %156, %157 : vector<16x32xf32>
    %159 = vector.broadcast %15 : vector<1x32xf32> to vector<16x32xf32>
    %160 = arith.addf %158, %159 : vector<16x32xf32>
    %161 = vector.extract_strided_slice %160 {offsets = [0, 0], sizes = [1, 32], strides = [1, 1]} : vector<16x32xf32> to vector<1x32xf32>
    %162 = vector.extract_strided_slice %160 {offsets = [8, 0], sizes = [1, 32], strides = [1, 1]} : vector<16x32xf32> to vector<1x32xf32>
    %cst_33 = arith.constant 0.000000e+00 : f32
    %163 = vector.broadcast %cst_33 : f32 to vector<6x32xf32>
    %164 = tpu.concatenate %161, %162, %163 in 0 : vector<1x32xf32>, vector<1x32xf32>, vector<6x32xf32> -> vector<8x32xf32>
    %cst_34 = arith.constant dense<0.000000e+00> : vector<8x128xf32>
    %165 = tpu.matmul %164, %6, %cst_34 {dimension_numbers = #tpu.dot_dimension_numbers<[1], [0], [0], [1], [0, 0, 1, 1], [], []>} : vector<8x32xf32>, vector<32x128xf32>, vector<8x128xf32> -> vector<8x128xf32>
    %166 = vector.broadcast %16 : vector<1x128xf32> to vector<8x128xf32>
    %167 = arith.addf %165, %166 : vector<8x128xf32>
    %168 = vector.extract_strided_slice %167 {offsets = [0, 0], sizes = [2, 128], strides = [1, 1]} : vector<8x128xf32> to vector<2x128xf32>
    %169 = tpu.iota {dimensions = array<i32: 1>} : vector<2x128xi32>
    %c10_i32 = arith.constant 10 : i32
    %170 = vector.broadcast %c10_i32 : i32 to vector<2x128xi32>
    %171 = arith.cmpi slt, %169, %170 : vector<2x128xi32>
    %cst_35 = arith.constant -1.000000e+30 : f32
    %172 = vector.broadcast %cst_35 : f32 to vector<2x128xf32>
    %173 = arith.select %171, %168, %172 : vector<2x128xi1>, vector<2x128xf32>
    %c10_i32_36 = arith.constant 10 : i32
    %174 = vector.broadcast %c10_i32_36 : i32 to vector<2x128xi32>
    %175 = arith.cmpi sge, %169, %174 : vector<2x128xi32>
    %c16_i32 = arith.constant 16 : i32
    %176 = vector.broadcast %c16_i32 : i32 to vector<2x128xi32>
    %177 = arith.cmpi slt, %169, %176 : vector<2x128xi32>
    %178 = arith.andi %175, %177 : vector<2x128xi1>
    %cst_37 = arith.constant -1.000000e+30 : f32
    %179 = vector.broadcast %cst_37 : f32 to vector<2x128xf32>
    %180 = arith.select %178, %168, %179 : vector<2x128xi1>, vector<2x128xf32>
    %181 = tpu.concatenate %173, %180 in 0 : vector<2x128xf32>, vector<2x128xf32> -> vector<4x128xf32>
    %182 = tpu.iota {dimensions = array<i32: 0>} : vector<4x1xi32>
    %c0_i32 = arith.constant 0 : i32
    %183 = vector.broadcast %c0_i32 : i32 to vector<4x1xi32>
    %c0_i32_38 = arith.constant 0 : i32
    %184 = vector.broadcast %c0_i32_38 : i32 to vector<4x1xi32>
    %185 = arith.cmpi eq, %182, %184 : vector<4x1xi32>
    %c0_39 = arith.constant 0 : index
    %186 = memref.load %arg1[%c0_39] : memref<4xi32, #tpu.memory_space<smem>>
    %187 = vector.broadcast %186 : i32 to vector<4x1xi32>
    %188 = arith.select %185, %187, %183 : vector<4x1xi1>, vector<4x1xi32>
    %c2_i32 = arith.constant 2 : i32
    %189 = vector.broadcast %c2_i32 : i32 to vector<4x1xi32>
    %190 = arith.cmpi eq, %182, %189 : vector<4x1xi32>
    %c2 = arith.constant 2 : index
    %191 = memref.load %arg1[%c2] : memref<4xi32, #tpu.memory_space<smem>>
    %c10_i32_40 = arith.constant 10 : i32
    %192 = arith.addi %c10_i32_40, %191 : i32
    %193 = vector.broadcast %192 : i32 to vector<4x1xi32>
    %194 = arith.select %190, %193, %188 : vector<4x1xi1>, vector<4x1xi32>
    %c1_i32 = arith.constant 1 : i32
    %195 = vector.broadcast %c1_i32 : i32 to vector<4x1xi32>
    %196 = arith.cmpi eq, %182, %195 : vector<4x1xi32>
    %c1 = arith.constant 1 : index
    %197 = memref.load %arg1[%c1] : memref<4xi32, #tpu.memory_space<smem>>
    %198 = vector.broadcast %197 : i32 to vector<4x1xi32>
    %199 = arith.select %196, %198, %194 : vector<4x1xi1>, vector<4x1xi32>
    %c3_i32 = arith.constant 3 : i32
    %200 = vector.broadcast %c3_i32 : i32 to vector<4x1xi32>
    %201 = arith.cmpi eq, %182, %200 : vector<4x1xi32>
    %c3 = arith.constant 3 : index
    %202 = memref.load %arg1[%c3] : memref<4xi32, #tpu.memory_space<smem>>
    %c10_i32_41 = arith.constant 10 : i32
    %203 = arith.addi %c10_i32_41, %202 : i32
    %204 = vector.broadcast %203 : i32 to vector<4x1xi32>
    %205 = arith.select %201, %204, %199 : vector<4x1xi1>, vector<4x1xi32>
    %cst_42 = arith.constant dense<0xFF800000> : vector<4xf32>
    %206 = vector.multi_reduction <maximumf>, %181, %cst_42 [1] : vector<4x128xf32> to vector<4xf32>
    %207 = vector.shape_cast %206 : vector<4xf32> to vector<4x1xf32>
    %208 = vector.broadcast %207 : vector<4x1xf32> to vector<4x128xf32>
    %209 = arith.subf %181, %208 : vector<4x128xf32>
    %210 = math.exp %209 : vector<4x128xf32>
    %cst_43 = arith.constant dense<0.000000e+00> : vector<4xf32>
    %211 = vector.multi_reduction <add>, %210, %cst_43 [1] : vector<4x128xf32> to vector<4xf32>
    %212 = vector.shape_cast %211 : vector<4xf32> to vector<4x1xf32>
    %213 = math.log %212 : vector<4x1xf32>
    %214 = arith.addf %207, %213 : vector<4x1xf32>
    %215 = tpu.iota {dimensions = array<i32: 1>} : vector<4x128xi32>
    %216 = vector.broadcast %205 : vector<4x1xi32> to vector<4x128xi32>
    %217 = arith.cmpi eq, %215, %216 : vector<4x128xi32>
    %cst_44 = arith.constant 0.000000e+00 : f32
    %218 = vector.broadcast %cst_44 : f32 to vector<4x128xf32>
    %219 = arith.select %217, %181, %218 : vector<4x128xi1>, vector<4x128xf32>
    %cst_45 = arith.constant dense<0.000000e+00> : vector<4xf32>
    %220 = vector.multi_reduction <add>, %219, %cst_45 [1] : vector<4x128xf32> to vector<4xf32>
    %221 = vector.shape_cast %220 : vector<4xf32> to vector<4x1xf32>
    %222 = arith.subf %214, %221 : vector<4x1xf32>
    %cst_46 = arith.constant 0.000000e+00 : f32
    %223 = vector.broadcast %cst_46 : f32 to vector<4x1xf32>
    %224 = arith.subf %223, %222 : vector<4x1xf32>
    %225 = math.exp %224 : vector<4x1xf32>
    %cst_47 = arith.constant 1.000000e+00 : f32
    %226 = vector.broadcast %cst_47 : f32 to vector<4x1xf32>
    %227 = arith.subf %226, %225 : vector<4x1xf32>
    %cst_48 = arith.constant 1.000000e+00 : f32
    %228 = vector.broadcast %cst_48 : f32 to vector<4x1xf32>
    %229 = arith.mulf %228, %227 : vector<4x1xf32>
    %230 = arith.mulf %229, %227 : vector<4x1xf32>
    %231 = arith.mulf %230, %222 : vector<4x1xf32>
    %232 = vector.shape_cast %231 : vector<4x1xf32> to vector<1x4x1xf32>
    %cst_49 = arith.constant dense<0.000000e+00> : vector<1xf32>
    %233 = vector.multi_reduction <add>, %232, %cst_49 [1, 2] : vector<1x4x1xf32> to vector<1xf32>
    %234 = vector.shape_cast %233 : vector<1xf32> to vector<1x1x1xf32>
    %235 = vector.extract %234[0, 0, 0] : f32 from vector<1x1x1xf32>
    %cst_50 = arith.constant 2.500000e-01 : f32
    %236 = arith.mulf %cst_50, %235 : f32
    %237 = tpu.iota {dimensions = array<i32: 0>} : vector<8x128xi32>
    %238 = tpu.iota {dimensions = array<i32: 1>} : vector<8x128xi32>
    %c7_i32 = arith.constant 7 : i32
    %239 = vector.broadcast %c7_i32 : i32 to vector<8x128xi32>
    %240 = arith.cmpi eq, %237, %239 : vector<8x128xi32>
    %c0_i32_51 = arith.constant 0 : i32
    %241 = vector.broadcast %c0_i32_51 : i32 to vector<8x128xi32>
    %242 = arith.cmpi eq, %238, %241 : vector<8x128xi32>
    %243 = arith.andi %240, %242 : vector<8x128xi1>
    %244 = vector.broadcast %236 : f32 to vector<8x128xf32>
    %245 = arith.select %243, %244, %167 : vector<8x128xi1>, vector<8x128xf32>
    %c0_52 = arith.constant 0 : index
    %c0_53 = arith.constant 0 : index
    %246 = vector.load %arg4[%c0_52, %c0_53] : memref<8x128xf32, #tpu.memory_space<vmem>>, vector<8x128xf32>
    tpu.vector_store %arg4[%c0_52, %c0_53], %245 {strides = array<i32>} : memref<8x128xf32, #tpu.memory_space<vmem>>, vector<8x128xf32>,
    return
  }
  func.func @transform_0(%arg0: i32, %arg1: memref<4xi32, #tpu.memory_space<smem>>) -> (i32, i32) {
    %c0_i32 = arith.constant 0 : i32
    %c0_i32_0 = arith.constant 0 : i32
    %c0_i32_1 = arith.constant 0 : i32
    return %c0_i32, %c0_i32_0 : i32, i32
  }
  func.func @transform_1(%arg0: i32, %arg1: memref<4xi32, #tpu.memory_space<smem>>) -> (i32, i32) {
    %c0_i32 = arith.constant 0 : i32
    %c0_i32_0 = arith.constant 0 : i32
    %c0_i32_1 = arith.constant 0 : i32
    return %c0_i32, %c0_i32_0 : i32, i32
  }
  func.func @transform_2(%arg0: i32, %arg1: memref<4xi32, #tpu.memory_space<smem>>) -> (i32, i32) {
    %c0_i32 = arith.constant 0 : i32
    %c0_i32_0 = arith.constant 0 : i32
    %c0_i32_1 = arith.constant 0 : i32
    return %c0_i32, %c0_i32_0 : i32, i32
  }
}

</mosaic_0001>

<bundles_post_ra>
// kernel: tpu_custom_call.1
= control target key start
LH: loop header
LB: loop body
LE: loop exit
PB: predicated region body
PF: predicated region fallthrough
CT: control target
= control target key end

     0   :  { %s917_s15 = smov [#allocation3]   ;;  %s1066_s0 = inlined_call_operand.hbm [shape: s32[4], index: 0, kind: input, shape index: {}]   ;;  %s1067_s1 = inlined_call_operand.hbm [shape: f32[24,32], index: 1, kind: input, shape index: {}]   ;;  %s1068_s2 = inlined_call_operand.hbm [shape: f32[272,128], index: 2, kind: input, shape index: {}]   ;;  %s1069_s3 = inlined_call_operand.hbm [shape: f32[8,128], index: 3, kind: output, shape index: {}]  }
   0x1   :  { %s9_s14 = sshll.u32 %s1066_s0, 4  ;;  %s10_s14 = int_to_ptr.hbm [resolvable:$true] %s9_s14 }
   0x2   :  { %12 = dma.hbm_to_smem %s10_s14, 16, %s917_s15, [#allocation2] }
   0x3   :  { %909 = dma.done.wait [#allocation2], 16 }
   0x4   :  { %910 = vsyncadd [#allocation2], 4294967280 }
   0x5   :  { %15 = sfence }
   0x6   :  { %16 = vsyncpa [#allocation5], 0 }
   0x7   :  { %17 = vsyncpa [#allocation8], 0 }
   0x8   :  { %18 = vsyncpa [#allocation6], 0  ;;  %s23_s18 = sshll.u32 %s1067_s1, 4  ;;  %s918_s19 = smov [#allocation4]   ;;  %s24_s18 = int_to_ptr.hbm [resolvable:$true] %s23_s18 }
   0x9   :  { %s25_s20 = sshll.u32 %s918_s19, 4  ;;  %s36_s0 = sshll.u32 %s1068_s2, 4  ;;  %s26_s20 = int_to_ptr.vmem [resolvable:$true] %s25_s20  ;;  %s37_s0 = int_to_ptr.hbm [resolvable:$true] %s36_s0 }
   0xa   :  { %s919_s23 = smov 128   ;;  %s920_s24 = smov 8  }
   0xb   :  { %31 = dma.hbm_to_vmem [thread:$0]  %s24_s18, 384, %s26_s20, [#allocation5], %s919_s23, %s919_s23, %s920_s24  }
   0xc   :  { %s921_s25 = smov [#allocation7]  }
   0xd   :  { %s38_s26 = sshll.u32 %s921_s25, 4  ;;  %s39_s26 = int_to_ptr.vmem [resolvable:$true] %s38_s26 }
   0xe   :  { %44 = dma.hbm_to_vmem [thread:$0]  %s37_s0, 4352, %s39_s26, [#allocation8], %s919_s23, %s919_s23, %s920_s24  }
   0xf   :  { %911 = dma.done.wait [#allocation5], 384  }
  0x10   :  { %912 = vsyncadd [#allocation5], 4294966912 }
  0x11   :  { %913 = dma.done.wait [#allocation8], 4352  }
  0x12   :  { %914 = vsyncadd [#allocation8], 4294962944  ;;  %v59_v0 = vld [vmem:[#allocation7 + $0x18] sm:$0xff]  ;;  %v58_v1 = vld [vmem:[#allocation7 + $0x10] sm:$0xff]  ;;  %vm90_vm0 = vcmask 261120   ;;  %s922_s1 = smov 96  }
  0x13   :  { %109 = vmatpush.msra.mxu0 %v59_v0  ;;  %v57_v2 = vld [vmem:[#allocation7 + $0x8] sm:$0xff]  ;;  %v56_v3 = vld [vmem:[#allocation7] sm:$0xff]  ;;  %v961_v5 = vld [vmem:[#allocation4 + $0x8] sm:$0xff]  ;;  %s923_s2 = smov 112   ;;  %vm136_vm1 = vcmask 130048   ;;  %vm249_vm2 = vcmask 64512  }
  0x14   :  { %v957_v4 = vld [vmem:[#allocation4] sm:$0xff]  ;;  %v965_v6 = vld [vmem:[#allocation7 + $0x100] sm:$0xff]  ;;  %v55_v18 = vld [vmem:[#allocation4 + $0x10] sm:$0x3]  ;;  %s924_s27 = smov 64   ;;  %s925_s28 = smov 16  }
  0x15   :  { %110 = vmatpush.msra.mxu0 %v58_v1  ;;  %v120_v7 = vperm.slane %v965_v6, 0  ;;  %v129_v19 = vsub.f32 1.0, %v55_v18  ;;  %v62_v18 = vld [vmem:[#allocation7 + $0x30] sm:$0xff]  ;;  %s671_s29 = sld [smem:[#allocation3]]  ;;  %s927_s8 = smov [#allocation9]  }
  0x16   :  { %s768_s30 = sld [smem:[#allocation3 + $0x2]]  ;;  %s736_s9 = sshll.u32 %s927_s8, 4  ;;  %s737_s9 = int_to_ptr.vmem [resolvable:$true] %s736_s9 }
  0x17   :  { %111 = vmatpush.msra.mxu0 %v57_v2  ;;  %v130_v20 = vmul.f32 1e+09, %v129_v19  ;;  %v61_v19 = vld [vmem:[#allocation7 + $0x28] sm:$0xff]  ;;  %s769_s4 = sld [smem:[#allocation3 + $0x1]]  ;;  %s738_s13 = sshll.u32 %s1069_s3, 4  ;;  %s739_s13 = int_to_ptr.hbm [resolvable:$true] %s738_s13 }
  0x18   :  { %s770_s5 = sld [smem:[#allocation3 + $0x3]] }
  0x19   :  { %112 = vmatpush.msra.mxu0 %v56_v3  ;;  %v243_v21 = vperm.slane %v130_v20, 0  ;;  %v132_v27 = vrot.slane %v130_v20, 1 }
  0x1a   :  { %749 = vmatmul.msk.f32.vlgmr.msra.gmra.mxu0 %vm90_vm0, %v957_v4 }
  0x1b   :  { %v244_v30 = vperm.slane %v132_v27, 0 }
  0x1c   :  { %s676_s6 = sadd.s32 10, %s768_s30 }
  0x1e   :  { %s685_s7 = sadd.s32 10, %s770_s5 }
  0x22   :  { %750 = vmatmul.msk.f32.gmra.mxu0 %vm90_vm0, %v961_v5 }
  0x97   :  { %v114_v8 = vpop.f32.mrf.mxu0 }
  0x98   :  { %v968_v9 = vadd.f32 %v120_v7, %v114_v8 }
  0x9a   :  { %134 = vrot.lane.b32.xlu1 %v968_v9, %s922_s1  ;;  %124 = vrot.lane.b32.xlu0 %v968_v9, %s923_s2 }
  0x9f   :  { %v117_v10 = vpop.f32.mrf.mxu0 }
  0xa0   :  { %v972_v11 = vadd.f32 %v120_v7, %v117_v10 }
  0xa2   :  { %187 = vrot.lane.b32.xlu2 %v972_v11, %s922_s1  ;;  %127 = vrot.lane.b32.xlu0 %v972_v11, %s923_s2 }
  0xfc   :  { %v188_v12 = vpop.permute.xlu2 %187 }
  0xfd   :  { %755 = vmatpush.xpose.msk.msra.mxu3 %vm136_vm1, %v188_v12 }
 0x100   :  { %756 = vmatmul.msk.f32.vlgmr.msra.gmra.mxu3 %vm136_vm1, %v972_v11 }
 0x10c   :  { %v135_v13 = vpop.permute.xlu1 %134  ;;  %v979_v14 = vpop.permute.xlu0 %124 }
 0x10d   :  { %751 = vmatpush.xpose.msk.msra.mxu2 %vm136_vm1, %v135_v13  ;;  %161 = vrot.lane.b32.xlu1 %v979_v14, %s922_s1  ;;  %v784_v60 = vpack.i.bf16 %v979_v14, %v968_v9 }
 0x110   :  { %752 = vmatmul.msk.f32.vlgmr.msra.gmra.mxu2 %vm136_vm1, %v968_v9 }
 0x114   :  { %v128_v15 = vpop.permute.xlu0 %127 }
 0x115   :  { %213 = vrot.lane.b32.xlu2 %v128_v15, %s922_s1 }
 0x16f   :  { %v214_v16 = vpop.permute.xlu2 %213 }
 0x170   :  { %757 = vmatpush.xpose.msk.msrb.mxu3 %vm136_vm1, %v214_v16 }
 0x173   :  { %758 = vmatmul.msk.f32.vlgmr.msrb.gmra.mxu3 %vm136_vm1, %v128_v15 }
 0x17f   :  { %v162_v17 = vpop.permute.xlu1 %161 }
 0x180   :  { %753 = vmatpush.xpose.msk.msrb.mxu2 %vm136_vm1, %v162_v17  ;;  %v63_v17 = vld [vmem:[#allocation7 + $0x38] sm:$0xff] }
 0x183   :  { %754 = vmatmul.msk.f32.vlgmr.msrb.gmra.mxu2 %vm136_vm1, %v979_v14  ;;  %v210_v26 = vpop.f32.mrf.mxu3 }
 0x184   :  { %v241_v36 = vmul.f32 0.25, %v210_v26 }
 0x186   :  { %v247_v41 = vsub.f32 %v241_v36, %v244_v30 }
 0x188   :  { %v256_v42 = vsel %vm249_vm2, %v247_v41, -inf }
 0x193   :  { %v158_v22 = vpop.f32.mrf.mxu2 }
 0x194   :  { %v239_v23 = vmul.f32 0.25, %v158_v22 }
 0x196   :  { %v245_v24 = vsub.f32 %v239_v23, %v243_v21  ;;  %v60_v23 = vld [vmem:[#allocation7 + $0x20] sm:$0xff] }
 0x198   :  { %v250_v25 = vsel %vm249_vm2, %v245_v24, -inf }
 0x199   :  { %251 = vmax.xlane.f32.xlu0 %v250_v25 }
 0x1f6   :  { %v236_v28 = vpop.f32.mrf.mxu3 }
 0x1f7   :  { %v242_v29 = vmul.f32 0.25, %v236_v28 }
 0x1f9   :  { %v248_v31 = vsub.f32 %v242_v29, %v244_v30  ;;  %v437_v29 = vperm.slane %v965_v6, 1 }
 0x1fb   :  { %v259_v32 = vsel %vm249_vm2, %v248_v31, -inf }
 0x1fc   :  { %260 = vmax.xlane.f32.xlu2 %v259_v32 }
 0x206   :  { %v184_v33 = vpop.f32.mrf.mxu2 }
 0x207   :  { %v240_v34 = vmul.f32 0.25, %v184_v33 }
 0x209   :  { %v246_v35 = vsub.f32 %v240_v34, %v243_v21 }
 0x20b   :  { %v253_v37 = vsel %vm249_vm2, %v246_v35, -inf }
 0x20c   :  { %254 = vmax.xlane.f32.xlu1 %v253_v37  ;;  %v252_v38 = vpop.xlane.xlu0 %251 }
 0x20d   :  { %v262_v39 = vsub.f32 %v245_v24, %v252_v38  ;;  %v926_v38 = vmov 32.0  }
 0x20f   :  { %v266_v40 = vmul.f32 1.442695, %v262_v39 }
 0x211   :  { %789 = vpow2.f32 %v266_v40 }
 0x214   :  { %257 = vmax.xlane.f32.xlu1 %v256_v42 }
 0x217   :  { %v790_v43 = vpop.eup %789 }
 0x218   :  { %v274_v44 = vsel %vm249_vm2, %v790_v43, 0.0 }
 0x219   :  { %275 = vadd.xlane.f32.xlu2 %v274_v44 }
 0x22d   :  { %372 = vrot.lane.b32.xlu1 %v128_v15, %s924_s27 }
 0x26f   :  { %v261_v45 = vpop.xlane.xlu2 %260 }
 0x270   :  { %v265_v46 = vsub.f32 %v248_v31, %v261_v45 }
 0x272   :  { %v272_v47 = vmul.f32 1.442695, %v265_v46 }
 0x274   :  { %791 = vpow2.f32 %v272_v47 }
 0x27a   :  { %v792_v48 = vpop.eup %791 }
 0x27b   :  { %v283_v49 = vsel %vm249_vm2, %v792_v48, 0.0 }
 0x27c   :  { %284 = vadd.xlane.f32.xlu2 %v283_v49 }
 0x27f   :  { %v255_v50 = vpop.xlane.xlu1 %254 }
 0x280   :  { %v263_v51 = vsub.f32 %v246_v35, %v255_v50 }
 0x282   :  { %v268_v52 = vmul.f32 1.442695, %v263_v51 }
 0x284   :  { %793 = vpow2.f32 %v268_v52 }
 0x287   :  { %v258_v53 = vpop.xlane.xlu1 %257 }
 0x288   :  { %v264_v54 = vsub.f32 %v247_v41, %v258_v53  ;;  %v67_v53 = vld [vmem:[#allocation7 + $0x58] sm:$0xff] }
 0x28a   :  { %v794_v55 = vpop.eup %793  ;;  %v270_v56 = vmul.f32 1.442695, %v264_v54  ;;  %v66_v54 = vld [vmem:[#allocation7 + $0x50] sm:$0xff] }
 0x28b   :  { %v277_v57 = vsel %vm249_vm2, %v794_v55, 0.0 }
 0x28c   :  { %795 = vpow2.f32 %v270_v56  ;;  %278 = vadd.xlane.f32.xlu0 %v277_v57  ;;  %v276_v61 = vpop.xlane.xlu2 %275  ;;  %v64_v56 = vld [vmem:[#allocation7 + $0x40] sm:$0xff] }
 0x292   :  { %v796_v58 = vpop.eup %795 }
 0x293   :  { %v280_v59 = vsel %vm249_vm2, %v796_v58, 0.0 }
 0x294   :  { %281 = vadd.xlane.f32.xlu2 %v280_v59 }
 0x29f   :  { %v373_v14 = vpop.permute.xlu1 %372 }
 0x2a0   :  { %785 = vrot.lane.b32.xlu0 %v784_v60, %s924_s27  ;;  %v83_v60 = vld [vmem:[#allocation7 + $0xd8] sm:$0xff] }
 0x2a1   :  { %547 = vmatpush.msra.mxu1 %v83_v60 }
 0x2ac   :  { %346 = vrot.lane.b32.xlu2 %v972_v11, %s924_s27 }
 0x2ef   :  { %v285_v62 = vpop.xlane.xlu2 %284 }
 0x2ff   :  { %v279_v0 = vpop.xlane.xlu0 %278 }
 0x307   :  { %v282_v63 = vpop.xlane.xlu2 %281 }
 0x308   :  { %797 = vrcp.f32 %v282_v63 }
 0x309   :  { %799 = vrcp.f32 %v276_v61  ;;  %v82_v61 = vld [vmem:[#allocation7 + $0xd0] sm:$0xff] }
 0x30a   :  { %801 = vrcp.f32 %v279_v0  ;;  %548 = vmatpush.msra.mxu1 %v82_v61 }
 0x30b   :  { %803 = vrcp.f32 %v285_v62  ;;  %v81_v62 = vld [vmem:[#allocation7 + $0xc8] sm:$0xff] }
 0x30c   :  { %805 = vrcp.f32 %v926_v38  ;;  %549 = vmatpush.msra.mxu1 %v81_v62  ;;  %v69_v38 = vld [vmem:[#allocation7 + $0x68] sm:$0xff]  ;;  %v570_v62 = vperm.slane %v965_v6, 5 }
 0x30e   :  { %v798_v1 = vpop.eup %797 }
 0x30f   :  { %v347_v2 = vpop.permute.xlu2 %346  ;;  %v292_v3 = vmul.f32 %v798_v1, %v796_v58  ;;  %v800_v7 = vpop.eup %799 }
 0x310   :  { %367 = vmatpush.msrb.mxu0 %v347_v2  ;;  %v802_v8 = vpop.eup %801  ;;  %v290_v11 = vmul.f32 %v800_v7, %v790_v43 }
 0x311   :  { %761 = vmatmul.msk.f32.vlgmr.msrb.gmra.mxu0 %vm249_vm2, %v292_v3  ;;  %v291_v13 = vmul.f32 %v802_v8, %v794_v55  ;;  %v804_v15 = vpop.eup %803  ;;  %v65_v55 = vld [vmem:[#allocation7 + $0x48] sm:$0xff] }
 0x312   :  { %v786_v10 = vpop.permute.xlu0 %785  ;;  %v293_v16 = vmul.f32 %v804_v15, %v792_v48  ;;  %v806_v39 = vpop.eup %805  ;;  %518 = vmatpush.msra.mxu0 %v67_v53 }
 0x313   :  { %v788_v9 = vunpack.i.h.bf16 %v786_v10  ;;  %v787_v12 = vunpack.i.l.bf16 %v786_v10  ;;  %v449_v40 = vmul.f32 32.0, %v806_v39  ;;  %vm453_vm3 = vweird.f32 %v806_v39 }
 0x314   :  { %519 = vmatpush.msra.mxu0 %v66_v54 }
 0x315   :  { %315 = vmatpush.msra.mxu2 %v787_v12  ;;  %341 = vmatpush.msra.mxu3 %v788_v9  ;;  %v450_v41 = vsub.f32 1.0, %v449_v40  ;;  %v499_v40 = vperm.slane %v965_v6, 4 }
 0x316   :  { %759 = vmatmul.msk.f32.vlgmr.msra.gmra.mxu2 %vm249_vm2, %v290_v11  ;;  %760 = vmatmul.msk.f32.vlgmr.msra.gmra.mxu3 %vm249_vm2, %v291_v13  ;;  %v493_v13 = vperm.slane %v965_v6, 2 }
 0x317   :  { %393 = vmatpush.msrb.mxu2 %v373_v14  ;;  %426 = vmatpush.msrb.mxu3 %v63_v17  ;;  %v451_v42 = vmul.f32 %v806_v39, %v450_v41  ;;  %v496_v17 = vperm.slane %v965_v6, 3 }
 0x318   :  { %520 = vmatpush.msra.mxu0 %v65_v55 }
 0x319   :  { %427 = vmatpush.msrb.mxu3 %v62_v18  ;;  %v452_v43 = vadd.f32 %v806_v39, %v451_v42 }
 0x31a   :  { %521 = vmatpush.msra.mxu0 %v64_v56 }
 0x31b   :  { %428 = vmatpush.msrb.mxu3 %v61_v19  ;;  %v1014_v44 = vsel %vm453_vm3, %v806_v39, %v452_v43  ;;  %v68_v39 = vld [vmem:[#allocation7 + $0x60] sm:$0xff] }
 0x31d   :  { %429 = vmatpush.msrb.mxu3 %v60_v23 }
 0x31e   :  { %762 = vmatmul.msk.f32.vlgmr.msrb.gmra.mxu2 %vm249_vm2, %v293_v16  ;;  %vm630_vm2 = vcmask 1041408  }
 0x38e   :  { %v369_v26 = vpop.f32.mrf.mxu0 }
 0x399   :  { %v317_v20 = vpop.f32.mrf.mxu2  ;;  %v343_v21 = vpop.f32.mrf.mxu3 }
 0x39a   :  { %399 = vrot.lane.b32.xlu0 %v343_v21, %s925_s28 }
 0x3a1   :  { %v395_v22 = vpop.f32.mrf.mxu2 }
 0x3a2   :  { %404 = vrot.lane.b32.xlu1 %v395_v22, %s925_s28 }
 0x40c   :  { %v400_v24 = vpop.permute.xlu0 %399 }
 0x40d   :  { %v402_v25 = vsel %vm136_vm1, %v317_v20, %v400_v24 }
 0x40e   :  { %763 = vmatmul.msk.f32.vlgmr.msrb.gmra.mxu3 %vm90_vm0, %v402_v25 }
 0x414   :  { %v405_v27 = vpop.permute.xlu1 %404 }
 0x415   :  { %v407_v28 = vsel %vm136_vm1, %v369_v26, %v405_v27  ;;  %v80_v27 = vld [vmem:[#allocation7 + $0xc0] sm:$0xff]  ;;  %vm628_vm1 = vcmask 1040384  }
 0x416   :  { %764 = vmatmul.msk.f32.gmra.mxu3 %vm90_vm0, %v407_v28  ;;  %550 = vmatpush.msra.mxu1 %v80_v27  ;;  %v79_v28 = vld [vmem:[#allocation7 + $0xb8] sm:$0xff] }
 0x418   :  { %551 = vmatpush.msra.mxu1 %v79_v28 }
 0x491   :  { %v431_v30 = vpop.f32.mrf.mxu3 }
 0x492   :  { %v438_v31 = vadd.f32 %v437_v29, %v431_v30  ;;  %v77_v30 = vld [vmem:[#allocation7 + $0xa8] sm:$0xff] }
 0x494   :  { %v440_v32 = vadd.f32 %v438_v31, %v957_v4  ;;  %v76_v31 = vld [vmem:[#allocation7 + $0xa0] sm:$0xff] }
 0x496   :  { %v442_v33 = vsel %vm90_vm0, %v440_v32, 0.0 }
 0x497   :  { %443 = vadd.xlane.f32.xlu0 %v442_v33  ;;  %v74_v33 = vld [vmem:[#allocation7 + $0x90] sm:$0xff] }
 0x499   :  { %v434_v34 = vpop.f32.mrf.mxu3 }
 0x49a   :  { %v439_v35 = vadd.f32 %v437_v29, %v434_v34  ;;  %v78_v29 = vld [vmem:[#allocation7 + $0xb0] sm:$0xff]  ;;  %v73_v34 = vld [vmem:[#allocation7 + $0x88] sm:$0xff] }
 0x49b   :  { %552 = vmatpush.msra.mxu1 %v78_v29 }
 0x49c   :  { %v441_v36 = vadd.f32 %v439_v35, %v961_v5  ;;  %v72_v35 = vld [vmem:[#allocation7 + $0x80] sm:$0xff] }
 0x49d   :  { %553 = vmatpush.msra.mxu1 %v77_v30 }
 0x49e   :  { %v445_v37 = vsel %vm90_vm0, %v441_v36, 0.0 }
 0x49f   :  { %446 = vadd.xlane.f32.xlu1 %v445_v37  ;;  %554 = vmatpush.msra.mxu1 %v76_v31  ;;  %v70_v37 = vld [vmem:[#allocation7 + $0x70] sm:$0xff] }
 0x50a   :  { %v444_v4 = vpop.xlane.xlu0 %443 }
 0x50b   :  { %v455_v45 = vmul.f32 %v1014_v44, %v444_v4 }
 0x50d   :  { %v457_v46 = vsub.f32 %v440_v32, %v455_v45  ;;  %v75_v32 = vld [vmem:[#allocation7 + $0x98] sm:$0xff] }
 0x50e   :  { %555 = vmatpush.msra.mxu1 %v75_v32 }
 0x50f   :  { %v459_v47 = vmul.f32 %v457_v46, %v457_v46 }
 0x510   :  { %556 = vmatpush.msra.mxu1 %v74_v33 }
 0x511   :  { %v461_v5 = vsel %vm90_vm0, %v459_v47, 0.0 }
 0x512   :  { %462 = vadd.xlane.f32.xlu2 %v461_v5  ;;  %v447_v48 = vpop.xlane.xlu1 %446  ;;  %557 = vmatpush.msra.mxu1 %v73_v34 }
 0x513   :  { %v456_v49 = vmul.f32 %v1014_v44, %v447_v48 }
 0x514   :  { %558 = vmatpush.msra.mxu1 %v72_v35 }
 0x515   :  { %v458_v50 = vsub.f32 %v441_v36, %v456_v49  ;;  %v71_v36 = vld [vmem:[#allocation7 + $0x78] sm:$0xff] }
 0x516   :  { %559 = vmatpush.msra.mxu1 %v71_v36 }
 0x517   :  { %v460_v51 = vmul.f32 %v458_v50, %v458_v50 }
 0x518   :  { %560 = vmatpush.msra.mxu1 %v70_v37 }
 0x519   :  { %v464_v52 = vsel %vm90_vm0, %v460_v51, 0.0 }
 0x51a   :  { %465 = vadd.xlane.f32.xlu0 %v464_v52  ;;  %561 = vmatpush.msra.mxu1 %v69_v38 }
 0x51c   :  { %562 = vmatpush.msra.mxu1 %v68_v39 }
 0x585   :  { %v463_v57 = vpop.xlane.xlu2 %462 }
 0x586   :  { %v467_v58 = vmul.f32 %v463_v57, %v1014_v44 }
 0x588   :  { %v469_v59 = vadd.f32 1e-12, %v467_v58 }
 0x58a   :  { %807 = vrsqrt.f32 %v469_v59  ;;  %vm477_vm5 = vweird.f32 %v469_v59 }
 0x58d   :  { %v466_v63 = vpop.xlane.xlu0 %465 }
 0x58e   :  { %v468_v0 = vmul.f32 %v466_v63, %v1014_v44 }
 0x590   :  { %v808_v1 = vpop.eup %807  ;;  %v470_v2 = vadd.f32 1e-12, %v468_v0 }
 0x591   :  { %v472_v3 = vmul.f32 %v808_v1, %v469_v59  ;;  %vm478_vm4 = vweird.f32 %v808_v1 }
 0x592   :  { %809 = vrsqrt.f32 %v470_v2  ;;  %vm479_vm6 = vmor %vm477_vm5, %vm478_vm4  ;;  %vm487_vm8 = vweird.f32 %v470_v2 }
 0x593   :  { %v473_v7 = vmul.f32 %v808_v1, %v472_v3 }
 0x595   :  { %v474_v8 = vmul.f32 0.5, %v473_v7 }
 0x597   :  { %v475_v10 = vsub.f32 1.5, %v474_v8 }
 0x598   :  { %v810_v9 = vpop.eup %809 }
 0x599   :  { %v476_v12 = vmul.f32 %v808_v1, %v475_v10  ;;  %v482_v11 = vmul.f32 %v810_v9, %v470_v2  ;;  %vm488_vm7 = vweird.f32 %v810_v9 }
 0x59a   :  { %vm489_vm9 = vmor %vm487_vm8, %vm488_vm7 }
 0x59b   :  { %v480_v14 = vsel %vm479_vm6, %v808_v1, %v476_v12  ;;  %v483_v15 = vmul.f32 %v810_v9, %v482_v11 }
 0x59c   :  { %v491_v16 = vmul.f32 %v480_v14, %v457_v46 }
 0x59d   :  { %v484_v18 = vmul.f32 0.5, %v483_v15 }
 0x59e   :  { %v494_v19 = vmul.f32 %v493_v13, %v491_v16 }
 0x59f   :  { %v485_v20 = vsub.f32 1.5, %v484_v18 }
 0x5a0   :  { %v1024_v21 = vadd.f32 %v496_v17, %v494_v19 }
 0x5a1   :  { %v486_v22 = vmul.f32 %v810_v9, %v485_v20 }
 0x5a2   :  { %765 = vmatmul.msk.f32.vlgmr.msra.gmra.mxu0 %vm90_vm0, %v1024_v21 }
 0x5a3   :  { %v490_v23 = vsel %vm489_vm9, %v810_v9, %v486_v22  ;;  %v87_v22 = vld [vmem:[#allocation7 + $0xf8] sm:$0xff] }
 0x5a4   :  { %v492_v24 = vmul.f32 %v490_v23, %v458_v50  ;;  %v86_v23 = vld [vmem:[#allocation7 + $0xf0] sm:$0xff]  ;;  %648 = vmatpush.msra.mxu2 %v87_v22 }
 0x5a6   :  { %v495_v25 = vmul.f32 %v493_v13, %v492_v24  ;;  %649 = vmatpush.msra.mxu2 %v86_v23 }
 0x5a8   :  { %v1028_v26 = vadd.f32 %v496_v17, %v495_v25  ;;  %v85_v25 = vld [vmem:[#allocation7 + $0xe8] sm:$0xff] }
 0x5a9   :  { %650 = vmatpush.msra.mxu2 %v85_v25 }
 0x5aa   :  { %766 = vmatmul.msk.f32.gmra.mxu0 %vm90_vm0, %v1028_v26 }
 0x61f   :  { %v523_v41 = vpop.f32.mrf.mxu0 }
 0x620   :  { %v524_v42 = vadd.f32 %v523_v41, %v499_v40 }
 0x622   :  { %v529_v43 = vmul.f32 %v524_v42, %v524_v42 }
 0x624   :  { %v531_v4 = vmul.f32 %v529_v43, %v524_v42 }
 0x626   :  { %v533_v45 = vmul.f32 0.044715, %v531_v4 }
 0x627   :  { %v526_v46 = vpop.f32.mrf.mxu0 }
 0x628   :  { %v527_v47 = vadd.f32 %v526_v46, %v499_v40  ;;  %v535_v5 = vadd.f32 %v533_v45, %v524_v42 }
 0x62a   :  { %v530_v48 = vmul.f32 %v527_v47, %v527_v47  ;;  %v537_v49 = vmul.f32 0.7978846, %v535_v5  ;;  %v622_v5 = vperm.slane %v965_v6, 7 }
 0x62c   :  { %v532_v50 = vmul.f32 %v530_v48, %v527_v47  ;;  %811 = vtanh.f32 %v537_v49 }
 0x62e   :  { %v534_v51 = vmul.f32 0.044715, %v532_v50 }
 0x630   :  { %v536_v52 = vadd.f32 %v534_v51, %v527_v47 }
 0x632   :  { %v812_v53 = vpop.eup %811  ;;  %v538_v54 = vmul.f32 0.7978846, %v536_v52 }
 0x633   :  { %v541_v55 = vadd.f32 1.0, %v812_v53  ;;  %v656_v53 = vlaneseq }
 0x634   :  { %813 = vtanh.f32 %v538_v54 }
 0x635   :  { %v543_v56 = vmul.f32 0.5, %v541_v55  ;;  %v1048_v54 = vshrl.u32 %v656_v53, 7 }
 0x637   :  { %v545_v57 = vmul.f32 %v543_v56, %v524_v42  ;;  %vm670_vm3 = vcmp.eq.s32.totalorder %v1048_v54, 0  ;;  %vm674_vm4 = vcmp.eq.s32.totalorder %v1048_v54, 2  ;;  %v677_v56 = vstv %s676_s6 }
 0x638   :  { %vm683_vm7 = vcmp.eq.s32.totalorder %v1048_v54, 3 }
 0x639   :  { %563 = vmatmul.f32.vlgmr.msra.gmra.mxu1 %v545_v57  ;;  %v1052_v57 = vand.u32 127, %v656_v53 }
 0x63a   :  { %v814_v58 = vpop.eup %813 }
 0x63b   :  { %v542_v59 = vadd.f32 1.0, %v814_v58  ;;  %v89_v58 = vld [vmem:[#allocation7 + $0x108] sm:$0xff]  ;;  %vm660_vm5 = vcmp.ge.s32.totalorder %v1052_v57, 10  ;;  %vm661_vm6 = vcmp.lt.s32.totalorder %v1052_v57, 16  ;;  %vm658_vm9 = vcmp.lt.s32.totalorder %v1052_v57, 10 }
 0x63c   :  { %vm662_vm8 = vmand %vm660_vm5, %vm661_vm6 }
 0x63d   :  { %v544_v60 = vmul.f32 0.5, %v542_v59 }
 0x63f   :  { %v546_v61 = vmul.f32 %v544_v60, %v527_v47  ;;  %v681_v60 = vstv %s769_s4 }
 0x641   :  { %566 = vmatmul.f32.gmra.mxu1 %v546_v61  ;;  %v632_v61 = vperm.slane %v89_v58, 0 }
 0x6b6   :  { %v564_v63 = vpop.f32.mrf.mxu1 }
 0x6b7   :  { %v571_v0 = vadd.f32 %v570_v62, %v564_v63  ;;  %v686_v63 = vstv %s685_s7 }
 0x6b9   :  { %v573_v1 = vadd.f32 %v571_v0, %v1024_v21 }
 0x6bb   :  { %v575_v2 = vsel %vm90_vm0, %v573_v1, 0.0 }
 0x6bc   :  { %576 = vadd.xlane.f32.xlu0 %v575_v2 }
 0x6be   :  { %v567_v3 = vpop.f32.mrf.mxu1 }
 0x6bf   :  { %v572_v7 = vadd.f32 %v570_v62, %v567_v3 }
 0x6c1   :  { %v574_v8 = vadd.f32 %v572_v7, %v1028_v26  ;;  %v84_v26 = vld [vmem:[#allocation7 + $0xe0] sm:$0xff] }
 0x6c2   :  { %651 = vmatpush.msra.mxu2 %v84_v26 }
 0x6c3   :  { %v578_v10 = vsel %vm90_vm0, %v574_v8, 0.0 }
 0x6c4   :  { %579 = vadd.xlane.f32.xlu1 %v578_v10 }
 0x72f   :  { %v577_v9 = vpop.xlane.xlu0 %576 }
 0x730   :  { %v581_v12 = vmul.f32 %v577_v9, %v1014_v44 }
 0x732   :  { %v583_v11 = vsub.f32 %v573_v1, %v581_v12 }
 0x734   :  { %v585_v13 = vmul.f32 %v583_v11, %v583_v11 }
 0x736   :  { %v587_v14 = vsel %vm90_vm0, %v585_v13, 0.0 }
 0x737   :  { %588 = vadd.xlane.f32.xlu1 %v587_v14  ;;  %v580_v15 = vpop.xlane.xlu1 %579 }
 0x738   :  { %v582_v16 = vmul.f32 %v580_v15, %v1014_v44 }
 0x73a   :  { %v584_v17 = vsub.f32 %v574_v8, %v582_v16 }
 0x73c   :  { %v586_v18 = vmul.f32 %v584_v17, %v584_v17 }
 0x73e   :  { %v590_v19 = vsel %vm90_vm0, %v586_v18, 0.0 }
 0x73f   :  { %591 = vadd.xlane.f32.xlu2 %v590_v19 }
 0x7aa   :  { %v589_v20 = vpop.xlane.xlu1 %588 }
 0x7ab   :  { %v593_v21 = vmul.f32 %v589_v20, %v1014_v44 }
 0x7ad   :  { %v595_v24 = vadd.f32 1e-12, %v593_v21 }
 0x7af   :  { %815 = vrsqrt.f32 %v595_v24  ;;  %vm603_vm11 = vweird.f32 %v595_v24 }
 0x7b2   :  { %v592_v27 = vpop.xlane.xlu2 %591 }
 0x7b3   :  { %v594_v28 = vmul.f32 %v592_v27, %v1014_v44  ;;  %v619_v44 = vperm.slane %v965_v6, 6  ;;  %v672_v6 = vstv %s671_s29 }
 0x7b4   :  { %v673_v55 = vsel %vm670_vm3, %v672_v6, 0 }
 0x7b5   :  { %v816_v29 = vpop.eup %815  ;;  %v596_v30 = vadd.f32 1e-12, %v594_v28  ;;  %v678_v59 = vsel %vm674_vm4, %v677_v56, %v673_v55 }
 0x7b6   :  { %v598_v31 = vmul.f32 %v816_v29, %v595_v24  ;;  %vm604_vm10 = vweird.f32 %v816_v29 }
 0x7b7   :  { %817 = vrsqrt.f32 %v596_v30  ;;  %vm605_vm12 = vmor %vm603_vm11, %vm604_vm10  ;;  %vm613_vm14 = vweird.f32 %v596_v30  ;;  %vm688_vm10 = vcmask 1043456  }
 0x7b8   :  { %v599_v32 = vmul.f32 %v816_v29, %v598_v31 }
 0x7ba   :  { %v600_v33 = vmul.f32 0.5, %v599_v32 }
 0x7bc   :  { %v601_v34 = vsub.f32 1.5, %v600_v33 }
 0x7bd   :  { %v818_v35 = vpop.eup %817 }
 0x7be   :  { %v608_v36 = vmul.f32 %v818_v35, %v596_v30  ;;  %v602_v37 = vmul.f32 %v816_v29, %v601_v34  ;;  %vm614_vm13 = vweird.f32 %v818_v35 }
 0x7bf   :  { %vm615_vm15 = vmor %vm613_vm14, %vm614_vm13  ;;  %vm725_vm13 = vcmp.eq.s32.totalorder %v1048_v54, 7  ;;  %vm726_vm14 = vcmp.eq.s32.totalorder %v1052_v57, 0 }
 0x7c0   :  { %v609_v38 = vmul.f32 %v818_v35, %v608_v36  ;;  %v606_v40 = vsel %vm605_vm12, %v816_v29, %v602_v37  ;;  %vm713_vm12 = vcmask 3072  }
 0x7c1   :  { %v617_v43 = vmul.f32 %v606_v40, %v583_v11 }
 0x7c2   :  { %v610_v39 = vmul.f32 0.5, %v609_v38 }
 0x7c3   :  { %v620_v46 = vmul.f32 %v619_v44, %v617_v43 }
 0x7c4   :  { %v611_v41 = vsub.f32 1.5, %v610_v39 }
 0x7c5   :  { %v623_v49 = vadd.f32 %v622_v5, %v620_v46 }
 0x7c6   :  { %v612_v42 = vmul.f32 %v818_v35, %v611_v41 }
 0x7c8   :  { %v616_v4 = vsel %vm615_vm15, %v818_v35, %v612_v42  ;;  %vm727_vm15 = vmand %vm725_vm13, %vm726_vm14 }
 0x7c9   :  { %v618_v45 = vmul.f32 %v616_v4, %v584_v17 }
 0x7cb   :  { %v621_v47 = vmul.f32 %v619_v44, %v618_v45 }
 0x7cd   :  { %v624_v48 = vadd.f32 %v622_v5, %v621_v47 }
 0x7cf   :  { %v626_v50 = vrot.slane %v624_v48, 7 }
 0x7d1   :  { %v629_v51 = vsel %vm628_vm1, %v623_v49, %v626_v50 }
 0x7d2   :  { %v631_v52 = vsel %vm630_vm2, %v629_v51, 0.0 }
 0x7d3   :  { %767 = vmatmul.msk.f32.vlgmr.msra.gmra.mxu2 %vm90_vm0, %v631_v52  ;;  %vm679_vm0 = vcmp.eq.s32.totalorder %v1048_v54, 1 }
 0x7d4   :  { %v682_v62 = vsel %vm679_vm0, %v681_v60, %v678_v59 }
 0x7d5   :  { %v687_v2 = vsel %vm683_vm7, %v686_v63, %v682_v62 }
 0x7d6   :  { %vm701_vm11 = vcmp.eq.s32.totalorder %v1052_v57, %v687_v2 }
 0x856   :  { %v653_v0 = vpop.f32.mrf.mxu2 }
 0x857   :  { %v654_v1 = vadd.f32 %v653_v0, %v632_v61 }
 0x859   :  { %v663_v3 = vsel %vm662_vm8, %v654_v1, -1e+30  ;;  %v659_v8 = vsel %vm658_vm9, %v654_v1, -1e+30 }
 0x85a   :  { %v665_v7 = vrot.slane %v663_v3, 6 }
 0x85c   :  { %v667_v10 = vsel %vm630_vm2, %v659_v8, %v665_v7 }
 0x85d   :  { %v689_v9 = vsel %vm688_vm10, %v667_v10, -inf  ;;  %v702_v12 = vsel %vm701_vm11, %v667_v10, 0.0 }
 0x85e   :  { %690 = vmax.xlane.f32.xlu0 %v689_v9  ;;  %v703_v11 = vsel %vm688_vm10, %v702_v12, 0.0 }
 0x85f   :  { %704 = vadd.xlane.f32.xlu1 %v703_v11 }
 0x8d1   :  { %v691_v13 = vpop.xlane.xlu0 %690 }
 0x8d2   :  { %v692_v14 = vsub.f32 %v667_v10, %v691_v13  ;;  %v705_v22 = vpop.xlane.xlu1 %704 }
 0x8d4   :  { %v693_v15 = vmul.f32 1.442695, %v692_v14 }
 0x8d6   :  { %819 = vpow2.f32 %v693_v15 }
 0x8dc   :  { %v820_v16 = vpop.eup %819 }
 0x8dd   :  { %v695_v17 = vsel %vm688_vm10, %v820_v16, 0.0 }
 0x8de   :  { %696 = vadd.xlane.f32.xlu2 %v695_v17 }
 0x951   :  { %v697_v18 = vpop.xlane.xlu2 %696 }
 0x952   :  { %821 = vlog2.f32 %v697_v18 }
 0x958   :  { %v822_v19 = vpop.eup %821 }
 0x959   :  { %v699_v20 = vmul.f32 0.6931472, %v822_v19 }
 0x95b   :  { %v700_v21 = vadd.f32 %v699_v20, %v691_v13 }
 0x95d   :  { %v706_v23 = vsub.f32 %v700_v21, %v705_v22 }
 0x95f   :  { %v707_v24 = vsub.f32 0.0, %v706_v23 }
 0x961   :  { %v708_v25 = vmul.f32 1.442695, %v707_v24 }
 0x963   :  { %823 = vpow2.f32 %v708_v25 }
 0x969   :  { %v824_v26 = vpop.eup %823 }
 0x96a   :  { %v710_v27 = vsub.f32 1.0, %v824_v26 }
 0x96c   :  { %v711_v28 = vmul.f32 %v710_v27, %v710_v27 }
 0x96e   :  { %v712_v29 = vmul.f32 %v711_v28, %v706_v23 }
 0x970   :  { %v714_v30 = vsel %vm713_vm12, %v712_v29, 0.0 }
 0x971   :  { %715 = vadd.xlane.f32.xlu0 %v714_v30 }
 0x9e4   :  { %v716_v31 = vpop.xlane.xlu0 %715 }
 0x9e5   :  { %v717_v32 = vrot.slane %v716_v31, 4 }
 0x9e7   :  { %v718_v33 = vadd.f32 %v717_v32, %v716_v31 }
 0x9e9   :  { %v719_v34 = vrot.slane %v718_v33, 2 }
 0x9eb   :  { %v720_v35 = vadd.f32 %v719_v34, %v718_v33 }
 0x9ed   :  { %v721_v36 = vrot.slane %v720_v35, 1 }
 0x9ef   :  { %v722_v37 = vadd.f32 %v721_v36, %v720_v35 }
 0x9f1   :  { %771 = vpush %v722_v37 }
 0xa22   :  { %s772_s10 = spop %771 }
 0xa23   :  { %s724_s14 = smul.f32 0.25, %s772_s10 }
 0xa25   :  { %v728_v38 = vstv %s724_s14 }
 0xa26   :  { %v729_v39 = vsel %vm727_vm15, %v728_v38, %v654_v1 }
 0xa27   :  { %730 = vst [vmem:[#allocation9] sm:$0xff] %v729_v39 }
 0xa28   :  { %741 = dma.vmem_to_hbm [thread:$0]  %s737_s9, 128, %s739_s13, [#allocation6]  }
 0xa29   :  { %915 = dma.done.wait [#allocation6], 128  }
 0xa2a   :  { %916 = vsyncadd [#allocation6], 4294967168 }
 0xa2b   :  { %746 = vsyncpa [#allocation5], 1 }
 0xa2c   :  { %747 = vsyncpa [#allocation8], 1 }
 0xa2d   :  { %748 = vsyncpa [#allocation6], 1 }

</bundles_post_ra>
